<compile_context>
chip_gen: v7x
topology: tpu7x:2x2x1
jax: 0.10.0
libtpu: 0.0.40
codegen_flags: <defaults>
</compile_context>

<pallas_src>
import jax
import jax.numpy as jnp
from jax.experimental import pallas as pl
from jax.experimental.pallas import tpu as pltpu


def _round_up(x, m):
    return (x + m - 1) // m * m


def mlp_kernel(x_ref, w1_ref, b1_ref, w2_ref, b2_ref, w3_ref, b3_ref, o_ref):
    # relu(x@W1+b1) -> relu(h@W2+b2) -> tanh(h@W3+b3)
    # All matmuls take bf16 inputs and accumulate in f32 on the MXU.
    x = x_ref[...]                                                  # bf16 tile
    h1 = jnp.dot(x, w1_ref[...], preferred_element_type=jnp.float32) + b1_ref[...]
    h1 = jnp.maximum(h1, 0.0).astype(jnp.bfloat16)
    h2 = jnp.dot(h1, w2_ref[...], preferred_element_type=jnp.float32) + b2_ref[...]
    h2 = jnp.maximum(h2, 0.0).astype(jnp.bfloat16)
    h3 = jnp.dot(h2, w3_ref[...], preferred_element_type=jnp.float32) + b3_ref[...]
    # W3 is lane-padded to 128 for the MXU; keep only the real action dims
    # for the (narrow, un-padded) HBM output.
    a = o_ref.shape[1]
    o_ref[...] = jnp.tanh(h3[:, :a]).astype(o_ref.dtype)


def _pick_block_b(batch):
    """Batch-tile heuristic (override with block_b=128 on v5e)."""
    b8 = _round_up(batch, 8)
    if b8 <= 256:
        return b8                          # one small tile
    if b8 <= 1024:
        return _round_up((b8 + 1) // 2, 8)  # 2 tiles -> both v7x TCs busy
    return 512                             # large batch: amortize step overhead


def mlp_forward(x, w1, b1, w2, b2, w3p, b3p, action_size, *, block_b=None):
    """y = tanh(relu(relu(x@W1+b1)@W2+b2)@W3+b3).

    Weights are (in, out), already bf16; w3p/b3p are lane-padded to 128
    (see prepare_params). Biases are f32 (added to the f32 accumulator).
    """
    B, S = x.shape
    H1 = w1.shape[1]
    H2 = w2.shape[1]
    A_pad = w3p.shape[1]
    A = action_size

    if block_b is None:
        block_b = _pick_block_b(B)
    block_b = min(block_b, _round_up(B, 8))
    B_pad = _round_up(B, block_b)

    # Cast activations to bf16 (halves x HBM traffic, feeds the MXU directly).
    xb = x.astype(jnp.bfloat16)
    if B_pad != B:
        xb = jnp.pad(xb, ((0, B_pad - B), (0, 0)))

    grid = (B_pad // block_b,)
    row_map = lambda i: (i, 0)
    # Constant index_map -> weights/biases DMA'd into VMEM once, resident
    # across all batch tiles.
    const_map = lambda i: (0, 0)

    flops = 2 * B_pad * (S * H1 + H1 * H2 + H2 * A_pad)
    bytes_accessed = (2 * (B_pad * S + S * H1 + H1 * H2 + H2 * A_pad)   # bf16
                      + 4 * (H1 + H2 + A_pad)                          # f32 biases
                      + 4 * B_pad * A)                                  # f32 out
    cost = pl.CostEstimate(flops=flops,
                           transcendentals=B_pad * A,   # tanh
                           bytes_accessed=bytes_accessed)

    out = pl.pallas_call(
        mlp_kernel,
        out_shape=jax.ShapeDtypeStruct((B_pad, A), jnp.float32),
        grid=grid,
        in_specs=[
            pl.BlockSpec((block_b, S), row_map),    # x tile (pipelined)
            pl.BlockSpec((S, H1), const_map),       # W1 (full, fetched once)
            pl.BlockSpec((1, H1), const_map),       # b1
            pl.BlockSpec((H1, H2), const_map),      # W2
            pl.BlockSpec((1, H2), const_map),       # b2
            pl.BlockSpec((H2, A_pad), const_map),   # W3 (lane-padded for MXU)
            pl.BlockSpec((1, A_pad), const_map),    # b3 (lane-padded)
        ],
        # Narrow, un-padded output block: (block_b, A) equals the full last
        # dim, contiguous rows in HBM -> no 32x padded writeback.
        out_specs=pl.BlockSpec((block_b, A), row_map),
        compiler_params=pltpu.CompilerParams(
            dimension_semantics=("parallel",)),
        cost_estimate=cost,
    )(xb, w1, b1, w2, b2, w3p, b3p)

    return out[:B]


def init_linear_params(key, in_features, out_features):
    # Matches torch.nn.Linear default init: U(-1/sqrt(in), 1/sqrt(in)).
    kw, kb = jax.random.split(key)
    bound = 1.0 / jnp.sqrt(jnp.float32(in_features))
    # torch stores W as (out, in); generate then transpose to (in, out).
    w = jax.random.uniform(kw, (out_features, in_features), jnp.float32,
                           minval=-bound, maxval=bound).T
    b = jax.random.uniform(kb, (1, out_features), jnp.float32,
                           minval=-bound, maxval=bound)
    return w, b


def prepare_params(w1, b1, w2, b2, w3, b3):
    """One-time prep: cast weights to bf16, lane-pad the action head to 128."""
    A = w3.shape[1]
    A_pad = max(_round_up(A, 128), 128)
    w3p = jnp.pad(w3, ((0, 0), (0, A_pad - A)))
    b3p = jnp.pad(b3, ((0, 0), (0, A_pad - A)))
    return (w1.astype(jnp.bfloat16), b1.astype(jnp.float32),
            w2.astype(jnp.bfloat16), b2.astype(jnp.float32),
            w3p.astype(jnp.bfloat16), b3p.astype(jnp.float32), A)


if __name__ == "__main__":
    state_size, action_size = 24, 4
    fc1_units, fc2_units = 256, 256
    batch = 8  # small demo shape; tiling kicks in for larger batches

    key = jax.random.PRNGKey(0)
    k0, k1, k2, k3 = jax.random.split(key, 4)

    w1, b1 = init_linear_params(k1, state_size, fc1_units)
    w2, b2 = init_linear_params(k2, fc1_units, fc2_units)
    w3, b3 = init_linear_params(k3, fc2_units, action_size)

    x = jax.random.normal(k0, (batch, state_size), jnp.float32)

    w1b, b1f, w2b, b2f, w3p, b3p, A = prepare_params(w1, b1, w2, b2, w3, b3)

    out = mlp_forward(x, w1b, b1f, w2b, b2f, w3p, b3p, A)
    out = jax.block_until_ready(out)

    # Pure-JAX f32 reference; tolerance relaxed because the kernel feeds the
    # MXU bf16 inputs (f32 accumulation).
    ref = jnp.tanh(
        jnp.maximum(jnp.maximum(x @ w1 + b1, 0.0) @ w2 + b2, 0.0) @ w3 + b3)
    assert out.shape == (batch, action_size)
    assert jnp.allclose(out, ref, atol=3e-2, rtol=1e-2), "mismatch vs reference"

    print("KERNEL_OK")
</pallas_src>

<mosaic_0001>
module attributes {stable_mosaic.version = 11 : i64} {
  func.func @mlp_kernel(%arg0: i32, %arg1: memref<8x24xbf16, #tpu.memory_space<vmem>>, %arg2: memref<24x256xbf16, #tpu.memory_space<vmem>>, %arg3: memref<1x256xf32, #tpu.memory_space<vmem>>, %arg4: memref<256x256xbf16, #tpu.memory_space<vmem>>, %arg5: memref<1x256xf32, #tpu.memory_space<vmem>>, %arg6: memref<256x128xbf16, #tpu.memory_space<vmem>>, %arg7: memref<1x128xf32, #tpu.memory_space<vmem>>, %arg8: memref<8x4xf32, #tpu.memory_space<vmem>>) attributes {dimension_semantics = [#tpu.dimension_semantics<parallel>], iteration_bounds = array<i64: 1>, scalar_prefetch = 0 : i64, scratch_operands = 0 : i64, tpu.core_type = #tpu.core_type<tc>, window_params = [{transform_indices = @transform_0, window_bounds = array<i64: 8, 24>}, {pipeline_mode = #tpu.pipeline_mode<synchronous>, transform_indices = @transform_1, window_bounds = array<i64: 24, 256>}, {pipeline_mode = #tpu.pipeline_mode<synchronous>, transform_indices = @transform_2, window_bounds = array<i64: 1, 256>}, {pipeline_mode = #tpu.pipeline_mode<synchronous>, transform_indices = @transform_3, window_bounds = array<i64: 256, 256>}, {pipeline_mode = #tpu.pipeline_mode<synchronous>, transform_indices = @transform_4, window_bounds = array<i64: 1, 256>}, {pipeline_mode = #tpu.pipeline_mode<synchronous>, transform_indices = @transform_5, window_bounds = array<i64: 256, 128>}, {pipeline_mode = #tpu.pipeline_mode<synchronous>, transform_indices = @transform_6, window_bounds = array<i64: 1, 128>}, {transform_indices = @transform_7, window_bounds = array<i64: 8, 4>}]} {
    %c0 = arith.constant 0 : index
    %c0_0 = arith.constant 0 : index
    %0 = vector.load %arg1[%c0, %c0_0] : memref<8x24xbf16, #tpu.memory_space<vmem>>, vector<8x24xbf16>
    %c0_1 = arith.constant 0 : index
    %c0_2 = arith.constant 0 : index
    %1 = vector.load %arg2[%c0_1, %c0_2] : memref<24x256xbf16, #tpu.memory_space<vmem>>, vector<24x256xbf16>
    %cst = arith.constant dense<0.000000e+00> : vector<8x256xf32>
    %2 = tpu.matmul %0, %1, %cst {dimension_numbers = #tpu.dot_dimension_numbers<[1], [0], [0], [1], [0, 0, 1, 1], [], []>} : vector<8x24xbf16>, vector<24x256xbf16>, vector<8x256xf32> -> vector<8x256xf32>
    %c0_3 = arith.constant 0 : index
    %c0_4 = arith.constant 0 : index
    %3 = vector.load %arg3[%c0_3, %c0_4] : memref<1x256xf32, #tpu.memory_space<vmem>>, vector<1x256xf32>
    %4 = vector.broadcast %3 : vector<1x256xf32> to vector<8x256xf32>
    %5 = arith.addf %2, %4 : vector<8x256xf32>
    %cst_5 = arith.constant 0.000000e+00 : f32
    %6 = vector.broadcast %cst_5 : f32 to vector<8x256xf32>
    %7 = arith.maximumf %5, %6 : vector<8x256xf32>
    %8 = arith.truncf %7 : vector<8x256xf32> to vector<8x256xbf16>
    %c0_6 = arith.constant 0 : index
    %c0_7 = arith.constant 0 : index
    %9 = vector.load %arg4[%c0_6, %c0_7] : memref<256x256xbf16, #tpu.memory_space<vmem>>, vector<256x256xbf16>
    %cst_8 = arith.constant dense<0.000000e+00> : vector<8x256xf32>
    %10 = tpu.matmul %8, %9, %cst_8 {dimension_numbers = #tpu.dot_dimension_numbers<[1], [0], [0], [1], [0, 0, 1, 1], [], []>} : vector<8x256xbf16>, vector<256x256xbf16>, vector<8x256xf32> -> vector<8x256xf32>
    %c0_9 = arith.constant 0 : index
    %c0_10 = arith.constant 0 : index
    %11 = vector.load %arg5[%c0_9, %c0_10] : memref<1x256xf32, #tpu.memory_space<vmem>>, vector<1x256xf32>
    %12 = vector.broadcast %11 : vector<1x256xf32> to vector<8x256xf32>
    %13 = arith.addf %10, %12 : vector<8x256xf32>
    %cst_11 = arith.constant 0.000000e+00 : f32
    %14 = vector.broadcast %cst_11 : f32 to vector<8x256xf32>
    %15 = arith.maximumf %13, %14 : vector<8x256xf32>
    %16 = arith.truncf %15 : vector<8x256xf32> to vector<8x256xbf16>
    %c0_12 = arith.constant 0 : index
    %c0_13 = arith.constant 0 : index
    %17 = vector.load %arg6[%c0_12, %c0_13] : memref<256x128xbf16, #tpu.memory_space<vmem>>, vector<256x128xbf16>
    %cst_14 = arith.constant dense<0.000000e+00> : vector<8x128xf32>
    %18 = tpu.matmul %16, %17, %cst_14 {dimension_numbers = #tpu.dot_dimension_numbers<[1], [0], [0], [1], [0, 0, 1, 1], [], []>} : vector<8x256xbf16>, vector<256x128xbf16>, vector<8x128xf32> -> vector<8x128xf32>
    %c0_15 = arith.constant 0 : index
    %c0_16 = arith.constant 0 : index
    %19 = vector.load %arg7[%c0_15, %c0_16] : memref<1x128xf32, #tpu.memory_space<vmem>>, vector<1x128xf32>
    %20 = vector.broadcast %19 : vector<1x128xf32> to vector<8x128xf32>
    %21 = arith.addf %18, %20 : vector<8x128xf32>
    %22 = vector.extract_strided_slice %21 {offsets = [0, 0], sizes = [8, 4], strides = [1, 1]} : vector<8x128xf32> to vector<8x4xf32>
    %23 = math.tanh %22 : vector<8x4xf32>
    %c0_17 = arith.constant 0 : index
    %c0_18 = arith.constant 0 : index
    %24 = vector.load %arg8[%c0_17, %c0_18] : memref<8x4xf32, #tpu.memory_space<vmem>>, vector<8x4xf32>
    tpu.vector_store %arg8[%c0_17, %c0_18], %23 {strides = array<i32>} : memref<8x4xf32, #tpu.memory_space<vmem>>, vector<8x4xf32>,
    return
  }
  func.func @transform_0(%arg0: i32) -> (i32, i32) {
    %c0_i32 = arith.constant 0 : i32
    %c0_i32_0 = arith.constant 0 : i32
    return %arg0, %c0_i32 : i32, i32
  }
  func.func @transform_1(%arg0: i32) -> (i32, i32) {
    %c0_i32 = arith.constant 0 : i32
    %c0_i32_0 = arith.constant 0 : i32
    %c0_i32_1 = arith.constant 0 : i32
    return %c0_i32, %c0_i32_0 : i32, i32
  }
  func.func @transform_2(%arg0: i32) -> (i32, i32) {
    %c0_i32 = arith.constant 0 : i32
    %c0_i32_0 = arith.constant 0 : i32
    %c0_i32_1 = arith.constant 0 : i32
    return %c0_i32, %c0_i32_0 : i32, i32
  }
  func.func @transform_3(%arg0: i32) -> (i32, i32) {
    %c0_i32 = arith.constant 0 : i32
    %c0_i32_0 = arith.constant 0 : i32
    %c0_i32_1 = arith.constant 0 : i32
    return %c0_i32, %c0_i32_0 : i32, i32
  }
  func.func @transform_4(%arg0: i32) -> (i32, i32) {
    %c0_i32 = arith.constant 0 : i32
    %c0_i32_0 = arith.constant 0 : i32
    %c0_i32_1 = arith.constant 0 : i32
    return %c0_i32, %c0_i32_0 : i32, i32
  }
  func.func @transform_5(%arg0: i32) -> (i32, i32) {
    %c0_i32 = arith.constant 0 : i32
    %c0_i32_0 = arith.constant 0 : i32
    %c0_i32_1 = arith.constant 0 : i32
    return %c0_i32, %c0_i32_0 : i32, i32
  }
  func.func @transform_6(%arg0: i32) -> (i32, i32) {
    %c0_i32 = arith.constant 0 : i32
    %c0_i32_0 = arith.constant 0 : i32
    %c0_i32_1 = arith.constant 0 : i32
    return %c0_i32, %c0_i32_0 : i32, i32
  }
  func.func @transform_7(%arg0: i32) -> (i32, i32) {
    %c0_i32 = arith.constant 0 : i32
    %c0_i32_0 = arith.constant 0 : i32
    return %arg0, %c0_i32 : i32, i32
  }
}

</mosaic_0001>

<bundles_post_ra>
// kernel: tpu_custom_call.1
= control target key start
LH: loop header
LB: loop body
LE: loop exit
PB: predicated region body
PF: predicated region fallthrough
CT: control target
= control target key end

     0   :  { %12 = vsyncpa [#allocation3], 0  ;;  %s967_s0 = inlined_call_operand.hbm [shape: bf16[8,24], index: 0, kind: input, shape index: {}]   ;;  %s968_s1 = inlined_call_operand.hbm [shape: bf16[24,256], index: 1, kind: input, shape index: {}]   ;;  %s969_s2 = inlined_call_operand.vmem [shape: f32[1,256], index: 2, kind: input, shape index: {}]   ;;  %s970_s3 = inlined_call_operand.hbm [shape: bf16[256,256], index: 3, kind: input, shape index: {}]   ;;  %s971_s4 = inlined_call_operand.vmem [shape: f32[1,256], index: 4, kind: input, shape index: {}]   ;;  %s972_s5 = inlined_call_operand.hbm [shape: bf16[256,128], index: 5, kind: input, shape index: {}]   ;;  %s973_s6 = inlined_call_operand.vmem [shape: f32[1,128], index: 6, kind: input, shape index: {}]   ;;  %s974_s7 = inlined_call_operand.vmem [shape: f32[8,4], index: 7, kind: output, shape index: {}]  }
   0x1   :  { %13 = vsyncpa [#allocation5], 0 }
   0x2   :  { %14 = vsyncpa [#allocation8], 0  ;;  %s852_s24 = smov [#allocation4]   ;;  %s758_s28 = scalar_lea.hbm %s968_s1, 384 }
   0x3   :  { %s30_s25 = sshll.u32 %s852_s24, 4  ;;  %p759_p0 = scmp.ne.s32.totalorder %s968_s1, %s758_s28  ;;  %s31_s25 = int_to_ptr.vmem [resolvable:$true] %s30_s25 }
   0x4   :  { %p762_p1 = scmp.lt.u32.totalorder %s758_s28, %s968_s1 }
   0x6   :  { %p764_p2 = pnand %p762_p1, %p759_p0 }
   0x8   :  { %767 = shalt.err (!%p764_p2)
}
   0x9   :  { %s768_s10 = scalar_lea.vmem %s31_s25, 384  ;;  %p773_p4 = scmp.lt.s32.totalorder %s31_s25, %s31_s25 }
   0xa   :  { %p769_p3 = scmp.ne.s32.totalorder %s31_s25, %s768_s10  ;;  %p774_p5 = scmp.lt.s32.totalorder %s768_s10, %s768_s10 }
   0xc   :  { %p775_p6 = por %p774_p5, %p773_p4 }
   0xe   :  { %p776_p7 = pnand %p775_p6, %p769_p3 }
  0x10   :  { %779 = shalt.err (!%p776_p7)
}
  0x11   :  { %s853_s11 = smov 128   ;;  %s854_s12 = smov 8  }
  0x12   :  { %36 = dma.hbm_to_vmem [thread:$0]  %s968_s1, 384, %s31_s25, [#allocation5], %s853_s11, %s853_s11, %s854_s12  }
  0x13   :  { %s855_s15 = smov [#allocation2]   ;;  %s856_s17 = smov [#allocation6]  }
  0x14   :  { %s21_s16 = sshll.u32 %s855_s15, 4  ;;  %s44_s18 = sshll.u32 %s856_s17, 4  ;;  %s22_s16 = int_to_ptr.vmem [resolvable:$true] %s21_s16  ;;  %s45_s18 = int_to_ptr.vmem [resolvable:$true] %s44_s18 }
  0x15   :  { %s780_s21 = scalar_lea.hbm %s967_s0, 64 }
  0x16   :  { %p781_p8 = scmp.ne.s32.totalorder %s967_s0, %s780_s21  ;;  %p784_p9 = scmp.lt.u32.totalorder %s780_s21, %s967_s0 }
  0x18   :  { %p786_p10 = pnand %p784_p9, %p781_p8 }
  0x1a   :  { %789 = shalt.err (!%p786_p10)
}
  0x1b   :  { %s790_s1 = scalar_lea.vmem %s22_s16, 64  ;;  %p795_p12 = scmp.lt.s32.totalorder %s22_s16, %s22_s16 }
  0x1c   :  { %p791_p11 = scmp.ne.s32.totalorder %s22_s16, %s790_s1  ;;  %p796_p13 = scmp.lt.s32.totalorder %s790_s1, %s790_s1 }
  0x1e   :  { %p797_p0 = por %p796_p13, %p795_p12 }
  0x20   :  { %p798_p1 = pnand %p797_p0, %p791_p11 }
  0x22   :  { %801 = shalt.err (!%p798_p1)
}
  0x23   :  { %24 = dma.hbm_to_vmem [thread:$0]  %s967_s0, 64, %s22_s16, [#allocation3]  }
  0x24   :  { %s802_s30 = scalar_lea.hbm %s970_s3, 4096 }
  0x25   :  { %p803_p2 = scmp.ne.s32.totalorder %s970_s3, %s802_s30  ;;  %p806_p3 = scmp.lt.u32.totalorder %s802_s30, %s970_s3 }
  0x27   :  { %p808_p4 = pnand %p806_p3, %p803_p2 }
  0x29   :  { %811 = shalt.err (!%p808_p4)
}
  0x2a   :  { %s812_s14 = scalar_lea.vmem %s45_s18, 4096  ;;  %p817_p6 = scmp.lt.s32.totalorder %s45_s18, %s45_s18 }
  0x2b   :  { %p813_p5 = scmp.ne.s32.totalorder %s45_s18, %s812_s14  ;;  %p818_p7 = scmp.lt.s32.totalorder %s812_s14, %s812_s14 }
  0x2d   :  { %p819_p8 = por %p818_p7, %p817_p6 }
  0x2f   :  { %p820_p9 = pnand %p819_p8, %p813_p5 }
  0x31   :  { %823 = shalt.err (!%p820_p9)
}
  0x32   :  { %50 = dma.hbm_to_vmem [thread:$0]  %s970_s3, 4096, %s45_s18, [#allocation5], %s853_s11, %s853_s11, %s854_s12  }
  0x33   :  { %s857_s16 = smov [#allocation7]   ;;  %s824_s21 = scalar_lea.hbm %s972_s5, 2048 }
  0x34   :  { %s58_s17 = sshll.u32 %s857_s16, 4  ;;  %p825_p10 = scmp.ne.s32.totalorder %s972_s5, %s824_s21  ;;  %s59_s17 = int_to_ptr.vmem [resolvable:$true] %s58_s17 }
  0x35   :  { %p828_p11 = scmp.lt.u32.totalorder %s824_s21, %s972_s5 }
  0x37   :  { %p830_p12 = pnand %p828_p11, %p825_p10 }
  0x39   :  { %833 = shalt.err (!%p830_p12)
}
  0x3a   :  { %s834_s1 = scalar_lea.vmem %s59_s17, 2048  ;;  %p839_p0 = scmp.lt.s32.totalorder %s59_s17, %s59_s17 }
  0x3b   :  { %p835_p13 = scmp.ne.s32.totalorder %s59_s17, %s834_s1  ;;  %p840_p1 = scmp.lt.s32.totalorder %s834_s1, %s834_s1 }
  0x3d   :  { %p841_p2 = por %p840_p1, %p839_p0 }
  0x3f   :  { %p842_p3 = pnand %p841_p2, %p835_p13 }
  0x41   :  { %845 = shalt.err (!%p842_p3)
}
  0x42   :  { %s858_s3 = smov 64   ;;  %s859_s11 = smov 4  }
  0x43   :  { %64 = dma.hbm_to_vmem [thread:$0]  %s972_s5, 2048, %s59_s17, [#allocation8], %s858_s3, %s858_s3, %s859_s11  }
  0x44   :  { %846 = dma.done.wait [#allocation3], 64  }
  0x45   :  { %847 = vsyncadd [#allocation3], 4294967232 }
  0x46   :  { %848 = dma.done.wait [#allocation5], 4480  }
  0x47   :  { %849 = vsyncadd [#allocation5], 4294962816 }
  0x48   :  { %850 = dma.done.wait [#allocation8], 2048  }
  0x49   :  { %851 = vsyncadd [#allocation8], 4294965248  ;;  %v860_v0 = vmov 0   ;;  %v687_v1 = vld [vmem:[#allocation4 + $0x4] ss:$8 sps:$4 sm:$0xff]   ;;  %v83_v3 = vld [vmem:[#allocation4 + $0x10] sm:$0xff]  ;;  %v86_v52 = vlaneseq }
  0x4a   :  { %154 = vmatprep.mubr.bf16.mxu0 %v860_v0  ;;  %v689_v2 = vld [vmem:[#allocation4] ss:$8 sps:$4 sm:$0xff]   ;;  %vm115_vm0 = vcmask 1043456   ;;  %122 = vmatprep.subr.bf16.mxu0 %v687_v1  ;;  %v604_v4 = vcombine.high %v83_v3, %v83_v3  ;;  %v603_v5 = vcombine.low %v83_v3, %v83_v3  ;;  %v692_v6 = vld [vmem:[#allocation6 + $0x4] ss:$8 sps:$4 sm:$0xff]   ;;  %vm111_vm1 = vcmask 195584  }
  0x4b   :  { %123 = vmatpush1.bf16.msra.mxu0 %v689_v2  ;;  %v694_v7 = vld [vmem:[#allocation6] ss:$8 sps:$4 sm:$0xff]   ;;  %371 = vmatprep.subr.bf16.mxu1 %v692_v6  ;;  %v695_v9 = vld [vmem:[#allocation6 + $0x14] ss:$8 sps:$4 sm:$0xff]   ;;  %v697_v10 = vld [vmem:[#allocation6 + $0x10] ss:$8 sps:$4 sm:$0xff]  }
  0x4c   :  { %605 = vmatprep.subr.msk.bf16.mxu0 %vm115_vm0, %v604_v4  ;;  %v117_v8 = vsel %vm115_vm0, %v603_v5, 0  ;;  %372 = vmatpush1.bf16.msra.mxu1 %v694_v7  ;;  %v698_v11 = vld [vmem:[#allocation6 + $0x24] ss:$8 sps:$4 sm:$0xff]   ;;  %v700_v13 = vld [vmem:[#allocation6 + $0x20] ss:$8 sps:$4 sm:$0xff]   ;;  %v744_v44 = vld [vmem:[#allocation7 + $0x50] sm:$0xff]  }
  0x4d   :  { %373 = vmatprep.subr.bf16.mxu1 %v695_v9  ;;  %v80_v12 = vld [vmem:[#allocation2] sm:$0xf]  ;;  %v701_v14 = vld [vmem:[#allocation6 + $0x34] ss:$8 sps:$4 sm:$0xff]   ;;  %v703_v15 = vld [vmem:[#allocation6 + $0x30] ss:$8 sps:$4 sm:$0xff]  }
  0x4e   :  { %v704_v16 = vld [vmem:[#allocation6 + $0x44] ss:$8 sps:$4 sm:$0xff]   ;;  %v706_v17 = vld [vmem:[#allocation6 + $0x40] ss:$8 sps:$4 sm:$0xff]   ;;  %v707_v18 = vld [vmem:[#allocation6 + $0x54] ss:$8 sps:$4 sm:$0xff]  }
  0x4f   :  { %125 = vmatpush1.bf16.msra.mxu0 %v117_v8  ;;  %v709_v19 = vld [vmem:[#allocation6 + $0x50] ss:$8 sps:$4 sm:$0xff]   ;;  %v710_v20 = vld [vmem:[#allocation6 + $0x64] ss:$8 sps:$4 sm:$0xff]   ;;  %v712_v21 = vld [vmem:[#allocation6 + $0x60] ss:$8 sps:$4 sm:$0xff]  }
  0x50   :  { %374 = vmatpush1.bf16.msra.mxu1 %v697_v10  ;;  %v713_v22 = vld [vmem:[#allocation6 + $0x74] ss:$8 sps:$4 sm:$0xff]   ;;  %v715_v23 = vld [vmem:[#allocation6 + $0x70] ss:$8 sps:$4 sm:$0xff]   ;;  %v716_v24 = vld [vmem:[#allocation6 + $0x84] ss:$8 sps:$4 sm:$0xff]  }
  0x51   :  { %375 = vmatprep.subr.bf16.mxu1 %v698_v11  ;;  %v718_v25 = vld [vmem:[#allocation6 + $0x80] ss:$8 sps:$4 sm:$0xff]   ;;  %v719_v26 = vld [vmem:[#allocation6 + $0x94] ss:$8 sps:$4 sm:$0xff]   ;;  %v721_v27 = vld [vmem:[#allocation6 + $0x90] ss:$8 sps:$4 sm:$0xff]  }
  0x52   :  { %606 = vmatmul.mubr.msk.bf16.vlgmr.msra.gmra.mrb[0].mxu0 %vm111_vm1, %v80_v12  ;;  %v722_v28 = vld [vmem:[#allocation6 + $0xa4] ss:$8 sps:$4 sm:$0xff]   ;;  %v724_v29 = vld [vmem:[#allocation6 + $0xa0] ss:$8 sps:$4 sm:$0xff]   ;;  %v725_v30 = vld [vmem:[#allocation6 + $0xb4] ss:$8 sps:$4 sm:$0xff]  }
  0x53   :  { %v727_v31 = vld [vmem:[#allocation6 + $0xb0] ss:$8 sps:$4 sm:$0xff]   ;;  %v728_v32 = vld [vmem:[#allocation6 + $0xc4] ss:$8 sps:$4 sm:$0xff]   ;;  %v730_v33 = vld [vmem:[#allocation6 + $0xc0] ss:$8 sps:$4 sm:$0xff]  }
  0x54   :  { %376 = vmatpush1.bf16.msra.mxu1 %v700_v13  ;;  %v731_v34 = vld [vmem:[#allocation6 + $0xd4] ss:$8 sps:$4 sm:$0xff]   ;;  %v733_v35 = vld [vmem:[#allocation6 + $0xd0] ss:$8 sps:$4 sm:$0xff]   ;;  %v734_v36 = vld [vmem:[#allocation6 + $0xe4] ss:$8 sps:$4 sm:$0xff]  }
  0x55   :  { %377 = vmatprep.subr.bf16.mxu1 %v701_v14  ;;  %v736_v37 = vld [vmem:[#allocation6 + $0xe0] ss:$8 sps:$4 sm:$0xff]   ;;  %v737_v38 = vld [vmem:[#allocation6 + $0xf4] ss:$8 sps:$4 sm:$0xff]   ;;  %v739_v39 = vld [vmem:[#allocation6 + $0xf0] ss:$8 sps:$4 sm:$0xff]  }
  0x56   :  { %v740_v40 = vld [vmem:[#allocation7 + $0x40] sm:$0xff]   ;;  %v742_v42 = vld [vmem:[#allocation7 + $0x48] sm:$0xff]   ;;  %v745_v45 = vld [vmem:[#allocation7 + $0x10] sm:$0xff]   ;;  %v87_v53 = vshrl.u32 %v86_v52, 7  ;;  %vm592_vm2 = vcmask 31744  }
  0x57   :  { %v741_v41 = vld [vmem:[#allocation7] sm:$0xff]   ;;  %656 = vmatprep.subr.bf16.mxu0 %v740_v40  ;;  %v743_v43 = vld [vmem:[#allocation7 + $0x8] sm:$0xff]   ;;  %v746_v46 = vld [vmem:[#allocation7 + $0x58] sm:$0xff]  }
  0x58   :  { %378 = vmatpush1.bf16.msra.mxu1 %v703_v15  ;;  %657 = vmatpush3.bf16.msra.mxu0 %v741_v41  ;;  %v747_v47 = vld [vmem:[#allocation7 + $0x18] sm:$0xff]   ;;  %v748_v48 = vld [vmem:[#allocation7 + $0x60] sm:$0xff]   ;;  %v750_v50 = vld [vmem:[#allocation7 + $0x68] sm:$0xff]   ;;  %v88_v54 = vsub.s32 0, %v87_v53  ;;  %v92_v56 = vsub.s32 1, %v87_v53 }
  0x59   :  { %379 = vmatprep.subr.bf16.mxu1 %v704_v16  ;;  %658 = vmatprep.subr.bf16.mxu0 %v742_v42  ;;  %v749_v49 = vld [vmem:[#allocation7 + $0x20] sm:$0xff]   ;;  %v751_v51 = vld [vmem:[#allocation7 + $0x28] sm:$0xff]   ;;  %v752_v5 = vld [vmem:[#allocation7 + $0x70] sm:$0xff]  }
  0x5a   :  { %v84_v55 = vld [vmem:[%s969_s2] sm:$0x3]  ;;  %v753_v6 = vld [vmem:[#allocation7 + $0x30] sm:$0xff]   ;;  %v754_v7 = vld [vmem:[#allocation7 + $0x78] sm:$0xff]  }
  0x5b   :  { %v89_v57 = vrot.slane %v84_v55, %v88_v54  ;;  %v93_v58 = vrot.slane %v84_v55, %v92_v56  ;;  %v755_v8 = vld [vmem:[#allocation7 + $0x38] sm:$0xff]   ;;  %v199_v9 = vld [vmem:[%s971_s4] sm:$0x3] }
  0x5c   :  { %380 = vmatpush1.bf16.msra.mxu1 %v706_v17  ;;  %659 = vmatpush3.bf16.msra.mxu0 %v743_v43  ;;  %v204_v10 = vrot.slane %v199_v9, %v88_v54  ;;  %v208_v11 = vrot.slane %v199_v9, %v92_v56 }
  0x5d   :  { %381 = vmatprep.subr.bf16.mxu1 %v707_v18  ;;  %660 = vmatprep.subr.bf16.mxu0 %v744_v44 }
  0x60   :  { %382 = vmatpush1.bf16.msra.mxu1 %v709_v19  ;;  %661 = vmatpush3.bf16.msra.mxu0 %v745_v45 }
  0x61   :  { %383 = vmatprep.subr.bf16.mxu1 %v710_v20  ;;  %662 = vmatprep.subr.bf16.mxu0 %v746_v46 }
  0x64   :  { %384 = vmatpush1.bf16.msra.mxu1 %v712_v21  ;;  %663 = vmatpush3.bf16.msra.mxu0 %v747_v47 }
  0x65   :  { %385 = vmatprep.subr.bf16.mxu1 %v713_v22  ;;  %664 = vmatprep.subr.bf16.mxu0 %v748_v48 }
  0x68   :  { %386 = vmatpush1.bf16.msra.mxu1 %v715_v23  ;;  %665 = vmatpush3.bf16.msra.mxu0 %v749_v49  ;;  %v639_v23 = vld [vmem:[%s973_s6] ss:$0 sm:$0xff] }
  0x69   :  { %387 = vmatprep.subr.bf16.mxu1 %v716_v24  ;;  %666 = vmatprep.subr.bf16.mxu0 %v750_v50 }
  0x6c   :  { %388 = vmatpush1.bf16.msra.mxu1 %v718_v25  ;;  %667 = vmatpush3.bf16.msra.mxu0 %v751_v51 }
  0x6d   :  { %389 = vmatprep.subr.bf16.mxu1 %v719_v26  ;;  %668 = vmatprep.subr.bf16.mxu0 %v752_v5 }
  0x70   :  { %390 = vmatpush1.bf16.msra.mxu1 %v721_v27  ;;  %669 = vmatpush3.bf16.msra.mxu0 %v753_v6 }
  0x71   :  { %391 = vmatprep.subr.bf16.mxu1 %v722_v28  ;;  %670 = vmatprep.subr.bf16.mxu0 %v754_v7 }
  0x74   :  { %392 = vmatpush1.bf16.msra.mxu1 %v724_v29  ;;  %671 = vmatpush3.bf16.msra.mxu0 %v755_v8 }
  0x75   :  { %393 = vmatprep.subr.bf16.mxu1 %v725_v30 }
  0x78   :  { %394 = vmatpush1.bf16.msra.mxu1 %v727_v31 }
  0x79   :  { %395 = vmatprep.subr.bf16.mxu1 %v728_v32 }
  0x7c   :  { %396 = vmatpush1.bf16.msra.mxu1 %v730_v33 }
  0x7d   :  { %397 = vmatprep.subr.bf16.mxu1 %v731_v34 }
  0x80   :  { %398 = vmatpush1.bf16.msra.mxu1 %v733_v35 }
  0x81   :  { %399 = vmatprep.subr.bf16.mxu1 %v734_v36 }
  0x84   :  { %400 = vmatpush1.bf16.msra.mxu1 %v736_v37 }
  0x85   :  { %401 = vmatprep.subr.bf16.mxu1 %v737_v38 }
  0x88   :  { %402 = vmatpush1.bf16.msra.mxu1 %v739_v39 }
 0x125   :  { %v156_v59 = vpop.f32.mrb[0].mxu0 }
 0x126   :  { %v157_v60 = vadd.f32 %v156_v59, %v89_v57  ;;  %v158_v61 = vpop.f32.mrb[1].mxu0 }
 0x127   :  { %v159_v62 = vadd.f32 %v158_v61, %v93_v58  ;;  %v160_v63 = vpop.f32.mrb[2].mxu0 }
 0x128   :  { %v163_v0 = vmax.f32 %v157_v60, 0.0  ;;  %v161_v1 = vpop.f32.mrb[3].mxu0 }
 0x129   :  { %v164_v2 = vmax.f32 %v159_v62, 0.0 }
 0x12a   :  { %v165_v4 = vpack.c.bf16 %v163_v0, %v163_v0 }
 0x12b   :  { %v166_v3 = vpack.c.bf16 %v164_v2, %v164_v2 }
 0x12d   :  { %403 = vmatprep.mubr.bf16.mxu1 %v166_v3 }
 0x12e   :  { %404 = vmatmul.mubr.bf16.vlgmr.msra.gmra.mrb[0].mxu1 %v165_v4 }
 0x201   :  { %v405_v12 = vpop.f32.mrb[0].mxu1 }
 0x202   :  { %v406_v13 = vadd.f32 %v405_v12, %v204_v10  ;;  %v407_v14 = vpop.f32.mrb[1].mxu1 }
 0x203   :  { %v408_v15 = vadd.f32 %v407_v14, %v208_v11  ;;  %v409_v16 = vpop.f32.mrb[2].mxu1 }
 0x204   :  { %v412_v17 = vmax.f32 %v406_v13, 0.0  ;;  %v410_v18 = vpop.f32.mrb[3].mxu1 }
 0x205   :  { %v413_v19 = vmax.f32 %v408_v15, 0.0 }
 0x206   :  { %v414_v21 = vpack.c.bf16 %v412_v17, %v412_v17 }
 0x207   :  { %v415_v20 = vpack.c.bf16 %v413_v19, %v413_v19 }
 0x209   :  { %583 = vmatprep.mubr.bf16.mxu0 %v415_v20 }
 0x20a   :  { %584 = vmatmul.mubr.bf16.vlgmr.msra.gmra.mrb[4].mxu0 %v414_v21 }
 0x2dd   :  { %v672_v22 = vpop.f32.mrb[4].mxu0 }
 0x2de   :  { %v673_v24 = vpop.f32.mrb[5].mxu0 }
 0x2df   :  { %v674_v25 = vadd.f32 %v673_v24, %v672_v22  ;;  %v675_v26 = vpop.f32.mrb[6].mxu0 }
 0x2e0   :  { %v676_v27 = vpop.f32.mrb[7].mxu0 }
 0x2e1   :  { %v586_v28 = vadd.f32 %v674_v25, %v639_v23 }
 0x2e3   :  { %756 = vtanh.f32 %v586_v28 }
 0x2ed   :  { %v757_v29 = vpop.eup %756 }
 0x2ee   :  { %593 = vst.msk [vmem:[%s974_s7] sm:$0xff] %vm592_vm2, %v757_v29 }
 0x2ef   :  { %598 = vsyncpa [#allocation3], 1 }
 0x2f0   :  { %599 = vsyncpa [#allocation5], 1 }
 0x2f1   :  { %600 = vsyncpa [#allocation8], 1 }

</bundles_post_ra>
